<compile_context>
chip_gen: v6e
topology: v6e:2x2x1
jax: 0.10.0
libtpu: 0.0.40
codegen_flags: <defaults>
</compile_context>

<pallas_src>
import functools

import jax
import jax.numpy as jnp
from jax.experimental import pallas as pl
from jax.experimental.pallas import tpu as pltpu

LANE = 128


def _round_up(n, m):
    return (n + m - 1) // m * m


def vae_kernel(
    x_ref, eps_ref,
    w1_ref, b1_ref,
    w2_ref, b2_ref,
    w3_ref, b3_ref,
    w4_ref, b4_ref,
    xhat_ref, ml_ref,
):
    bf16 = jnp.bfloat16
    x = x_ref[...]  # (TB, D_pad) bf16

    # ---- encoder: Linear(D,16) + ReLU ----
    h = jnp.dot(x, w1_ref[...], preferred_element_type=jnp.float32) + b1_ref[...]
    h = jnp.maximum(h, 0.0)

    # ---- fused mean/logvar head: one matmul, lanes [0:128)=mean, [128:256)=logvar ----
    ml = jnp.dot(h.astype(bf16), w2_ref[...],
                 preferred_element_type=jnp.float32) + b2_ref[...]
    ml_ref[...] = ml

    l_pad = ml.shape[-1] // 2
    mean = ml[:, :l_pad]
    logvar = ml[:, l_pad:]

    # ---- reparameterize: z = mean + eps * exp(0.5 * logvar)  (f32, EUP exp) ----
    z = mean + eps_ref[...] * jnp.exp(0.5 * logvar)

    # ---- decoder: Linear(L,16) + ReLU + Linear(16,D) + Sigmoid ----
    d = jnp.dot(z.astype(bf16), w3_ref[...],
                preferred_element_type=jnp.float32) + b3_ref[...]
    d = jnp.maximum(d, 0.0)
    logits = jnp.dot(d.astype(bf16), w4_ref[...],
                     preferred_element_type=jnp.float32) + b4_ref[...]
    xhat_ref[...] = jax.nn.sigmoid(logits)


@functools.partial(jax.jit, static_argnames=("block_b",))
def vae_forward(x, eps, padded_params, *, block_b=1024):
    """x: (B, input_dim) f32, eps: (B, latent_dim) f32 standard-normal noise."""
    w1, b1, w2, b2, w3, b3, w4, b4 = padded_params
    B, D = x.shape
    L = eps.shape[-1]
    D_pad, H_pad = w1.shape
    L_pad2 = w2.shape[1]
    L_pad = L_pad2 // 2

    # Batch tile: multiple of 16 (bf16 sublane packing); as large as block_b allows.
    TB = min(block_b, _round_up(B, 16))
    B_pad = _round_up(B, TB)

    # Zero-pad + cast activations into lane-dense bf16/f32 slabs.
    x_p = jnp.zeros((B_pad, D_pad), jnp.bfloat16).at[:B, :D].set(
        x.astype(jnp.bfloat16))
    eps_p = jnp.zeros((B_pad, L_pad), jnp.float32).at[:B, :L].set(eps)

    def row_spec(feat):
        return pl.BlockSpec((TB, feat), lambda i: (i, 0))

    def const_spec(arr):
        return pl.BlockSpec(arr.shape, lambda i: (0, 0))

    grid_spec = pltpu.PrefetchScalarGridSpec(
        num_scalar_prefetch=0,
        grid=(B_pad // TB,),
        in_specs=[
            row_spec(D_pad), row_spec(L_pad),
            const_spec(w1), const_spec(b1),
            const_spec(w2), const_spec(b2),
            const_spec(w3), const_spec(b3),
            const_spec(w4), const_spec(b4),
        ],
        out_specs=(row_spec(D_pad), row_spec(L_pad2)),
    )

    xhat_p, ml_p = pl.pallas_call(
        vae_kernel,
        out_shape=(
            jax.ShapeDtypeStruct((B_pad, D_pad), jnp.float32),   # x_hat (padded)
            jax.ShapeDtypeStruct((B_pad, L_pad2), jnp.float32),  # [mean | logvar] (padded)
        ),
        grid_spec=grid_spec,
        compiler_params=pltpu.CompilerParams(
            dimension_semantics=("parallel",),
            vmem_limit_bytes=32 * 1024 * 1024,
        ),
    )(x_p, eps_p, w1, b1, w2, b2, w3, b3, w4, b4)

    x_hat = xhat_p[:B, :D]
    mean = ml_p[:B, :L]
    logvar = ml_p[:B, L_pad:L_pad + L]
    return x_hat, mean, logvar


def init_params(key, input_dim, latent_dim, hidden=16):
    """Deterministic init matching nn.Linear's U(-1/sqrt(fan_in), 1/sqrt(fan_in)).
    Weights stored as (in, out) so the kernel computes x @ W + b (== torch x @ W.T + b)."""
    def linear(k, fan_in, fan_out):
        kw, kb = jax.random.split(k)
        bound = 1.0 / jnp.sqrt(fan_in)
        w = jax.random.uniform(kw, (fan_in, fan_out), jnp.float32, -bound, bound)
        b = jax.random.uniform(kb, (1, fan_out), jnp.float32, -bound, bound)
        return w, b

    k1, k2, k3, k4 = jax.random.split(key, 4)
    w1, b1 = linear(k1, input_dim, hidden)          # encoder.0
    w2, b2 = linear(k2, hidden, 2 * latent_dim)     # encoder.2
    w3, b3 = linear(k3, latent_dim, hidden)         # decoder.0
    w4, b4 = linear(k4, hidden, input_dim)          # decoder.2
    return (w1, b1, w2, b2, w3, b3, w4, b4)


def pad_params(params, input_dim, latent_dim, hidden=16):
    """Zero-pad every feature dim to 128 lanes; cast weights to bf16 (MXU input type).
    Encoder head columns are rearranged so mean fills lanes [0,128) and logvar [128,256)."""
    w1, b1, w2, b2, w3, b3, w4, b4 = params
    D_pad = _round_up(input_dim, LANE)
    H_pad = _round_up(hidden, LANE)
    L_pad = _round_up(latent_dim, LANE)

    def pad_w(w, rin, rout):
        return jnp.zeros((rin, rout), jnp.float32).at[:w.shape[0], :w.shape[1]].set(w)

    def pad_b(b, rout):
        return jnp.zeros((1, rout), jnp.float32).at[:, :b.shape[1]].set(b)

    w1p, b1p = pad_w(w1, D_pad, H_pad), pad_b(b1, H_pad)
    # split the (hidden, 2L) head into mean/logvar halves, pad each to 128 lanes, re-concat.
    w2m, w2v = w2[:, :latent_dim], w2[:, latent_dim:]
    b2m, b2v = b2[:, :latent_dim], b2[:, latent_dim:]
    w2p = jnp.concatenate([pad_w(w2m, H_pad, L_pad), pad_w(w2v, H_pad, L_pad)], axis=1)
    b2p = jnp.concatenate([pad_b(b2m, L_pad), pad_b(b2v, L_pad)], axis=1)
    w3p, b3p = pad_w(w3, L_pad, H_pad), pad_b(b3, H_pad)
    w4p, b4p = pad_w(w4, H_pad, D_pad), pad_b(b4, D_pad)

    bf16 = jnp.bfloat16
    return (w1p.astype(bf16), b1p,
            w2p.astype(bf16), b2p,
            w3p.astype(bf16), b3p,
            w4p.astype(bf16), b4p)


def ref_forward(x, eps, params):
    """Pure-JAX reference mirroring the kernel's bf16-matmul / f32-accumulate arithmetic."""
    w1, b1, w2, b2, w3, b3, w4, b4 = params
    bf16 = jnp.bfloat16

    def mm(a, w):
        return jnp.dot(a.astype(bf16), w.astype(bf16),
                       preferred_element_type=jnp.float32)

    L = eps.shape[-1]
    h = jnp.maximum(mm(x, w1) + b1, 0.0)
    ml = mm(h, w2) + b2
    mean, logvar = ml[:, :L], ml[:, L:]
    z = mean + eps * jnp.exp(0.5 * logvar)
    d = jnp.maximum(mm(z, w3) + b3, 0.0)
    x_hat = jax.nn.sigmoid(mm(d, w4) + b4)
    return x_hat, mean, logvar


if __name__ == "__main__":
    B, INPUT_DIM, LATENT_DIM = 8, 32, 4

    key = jax.random.PRNGKey(0)
    k_params, k_x, k_eps = jax.random.split(key, 3)

    params_f32 = init_params(k_params, INPUT_DIM, LATENT_DIM)
    params_pad = pad_params(params_f32, INPUT_DIM, LATENT_DIM)

    x = jax.random.normal(k_x, (B, INPUT_DIM), jnp.float32)
    # torch.randn_like(std) -> standard normal noise, generated deterministically here
    eps = jax.random.normal(k_eps, (B, LATENT_DIM), jnp.float32)

    x_hat, mean, logvar = jax.block_until_ready(vae_forward(x, eps, params_pad))

    # reference check (bf16 matmul inputs, f32 accumulation — same as the kernel)
    xh_r, m_r, lv_r = ref_forward(x, eps, params_f32)
    assert x_hat.shape == (B, INPUT_DIM) and mean.shape == (B, LATENT_DIM)
    assert jnp.allclose(x_hat, xh_r, atol=1e-2), "x_hat mismatch"
    assert jnp.allclose(mean, m_r, atol=1e-2), "mean mismatch"
    assert jnp.allclose(logvar, lv_r, atol=1e-2), "logvar mismatch"

    print("KERNEL_OK")
</pallas_src>

<mosaic_0001>
module attributes {stable_mosaic.version = 11 : i64} {
  func.func @vae_kernel(%arg0: i32, %arg1: memref<16x128xbf16, #tpu.memory_space<vmem>>, %arg2: memref<16x128xf32, #tpu.memory_space<vmem>>, %arg3: memref<128x128xbf16, #tpu.memory_space<vmem>>, %arg4: memref<1x128xf32, #tpu.memory_space<vmem>>, %arg5: memref<128x256xbf16, #tpu.memory_space<vmem>>, %arg6: memref<1x256xf32, #tpu.memory_space<vmem>>, %arg7: memref<128x128xbf16, #tpu.memory_space<vmem>>, %arg8: memref<1x128xf32, #tpu.memory_space<vmem>>, %arg9: memref<128x128xbf16, #tpu.memory_space<vmem>>, %arg10: memref<1x128xf32, #tpu.memory_space<vmem>>, %arg11: memref<16x128xf32, #tpu.memory_space<vmem>>, %arg12: memref<16x256xf32, #tpu.memory_space<vmem>>) attributes {dimension_semantics = [#tpu.dimension_semantics<parallel>], iteration_bounds = array<i64: 1>, scalar_prefetch = 0 : i64, scratch_operands = 0 : i64, tpu.core_type = #tpu.core_type<tc>, window_params = [{transform_indices = @transform_0, window_bounds = array<i64: 16, 128>}, {transform_indices = @transform_1, window_bounds = array<i64: 16, 128>}, {pipeline_mode = #tpu.pipeline_mode<synchronous>, transform_indices = @transform_2, window_bounds = array<i64: 128, 128>}, {pipeline_mode = #tpu.pipeline_mode<synchronous>, transform_indices = @transform_3, window_bounds = array<i64: 1, 128>}, {pipeline_mode = #tpu.pipeline_mode<synchronous>, transform_indices = @transform_4, window_bounds = array<i64: 128, 256>}, {pipeline_mode = #tpu.pipeline_mode<synchronous>, transform_indices = @transform_5, window_bounds = array<i64: 1, 256>}, {pipeline_mode = #tpu.pipeline_mode<synchronous>, transform_indices = @transform_6, window_bounds = array<i64: 128, 128>}, {pipeline_mode = #tpu.pipeline_mode<synchronous>, transform_indices = @transform_7, window_bounds = array<i64: 1, 128>}, {pipeline_mode = #tpu.pipeline_mode<synchronous>, transform_indices = @transform_8, window_bounds = array<i64: 128, 128>}, {pipeline_mode = #tpu.pipeline_mode<synchronous>, transform_indices = @transform_9, window_bounds = array<i64: 1, 128>}, {transform_indices = @transform_10, window_bounds = array<i64: 16, 128>}, {transform_indices = @transform_11, window_bounds = array<i64: 16, 256>}]} {
    %c0 = arith.constant 0 : index
    %c0_0 = arith.constant 0 : index
    %0 = vector.load %arg1[%c0, %c0_0] : memref<16x128xbf16, #tpu.memory_space<vmem>>, vector<16x128xbf16>
    %c0_1 = arith.constant 0 : index
    %c0_2 = arith.constant 0 : index
    %1 = vector.load %arg3[%c0_1, %c0_2] : memref<128x128xbf16, #tpu.memory_space<vmem>>, vector<128x128xbf16>
    %cst = arith.constant dense<0.000000e+00> : vector<16x128xf32>
    %2 = tpu.matmul %0, %1, %cst {dimension_numbers = #tpu.dot_dimension_numbers<[1], [0], [0], [1], [0, 0, 1, 1], [], []>} : vector<16x128xbf16>, vector<128x128xbf16>, vector<16x128xf32> -> vector<16x128xf32>
    %c0_3 = arith.constant 0 : index
    %c0_4 = arith.constant 0 : index
    %3 = vector.load %arg4[%c0_3, %c0_4] : memref<1x128xf32, #tpu.memory_space<vmem>>, vector<1x128xf32>
    %4 = vector.broadcast %3 : vector<1x128xf32> to vector<16x128xf32>
    %5 = arith.addf %2, %4 : vector<16x128xf32>
    %cst_5 = arith.constant 0.000000e+00 : f32
    %6 = vector.broadcast %cst_5 : f32 to vector<16x128xf32>
    %7 = arith.maximumf %5, %6 : vector<16x128xf32>
    %8 = arith.truncf %7 : vector<16x128xf32> to vector<16x128xbf16>
    %c0_6 = arith.constant 0 : index
    %c0_7 = arith.constant 0 : index
    %9 = vector.load %arg5[%c0_6, %c0_7] : memref<128x256xbf16, #tpu.memory_space<vmem>>, vector<128x256xbf16>
    %cst_8 = arith.constant dense<0.000000e+00> : vector<16x256xf32>
    %10 = tpu.matmul %8, %9, %cst_8 {dimension_numbers = #tpu.dot_dimension_numbers<[1], [0], [0], [1], [0, 0, 1, 1], [], []>} : vector<16x128xbf16>, vector<128x256xbf16>, vector<16x256xf32> -> vector<16x256xf32>
    %c0_9 = arith.constant 0 : index
    %c0_10 = arith.constant 0 : index
    %11 = vector.load %arg6[%c0_9, %c0_10] : memref<1x256xf32, #tpu.memory_space<vmem>>, vector<1x256xf32>
    %12 = vector.broadcast %11 : vector<1x256xf32> to vector<16x256xf32>
    %13 = arith.addf %10, %12 : vector<16x256xf32>
    %c0_11 = arith.constant 0 : index
    %c0_12 = arith.constant 0 : index
    %14 = vector.load %arg12[%c0_11, %c0_12] : memref<16x256xf32, #tpu.memory_space<vmem>>, vector<16x256xf32>
    tpu.vector_store %arg12[%c0_11, %c0_12], %13 {strides = array<i32>} : memref<16x256xf32, #tpu.memory_space<vmem>>, vector<16x256xf32>,
    %15 = vector.extract_strided_slice %13 {offsets = [0, 0], sizes = [16, 128], strides = [1, 1]} : vector<16x256xf32> to vector<16x128xf32>
    %16 = vector.extract_strided_slice %13 {offsets = [0, 128], sizes = [16, 128], strides = [1, 1]} : vector<16x256xf32> to vector<16x128xf32>
    %c0_13 = arith.constant 0 : index
    %c0_14 = arith.constant 0 : index
    %17 = vector.load %arg2[%c0_13, %c0_14] : memref<16x128xf32, #tpu.memory_space<vmem>>, vector<16x128xf32>
    %cst_15 = arith.constant 5.000000e-01 : f32
    %18 = vector.broadcast %cst_15 : f32 to vector<16x128xf32>
    %19 = arith.mulf %18, %16 : vector<16x128xf32>
    %20 = math.exp %19 : vector<16x128xf32>
    %21 = arith.mulf %17, %20 : vector<16x128xf32>
    %22 = arith.addf %15, %21 : vector<16x128xf32>
    %23 = arith.truncf %22 : vector<16x128xf32> to vector<16x128xbf16>
    %c0_16 = arith.constant 0 : index
    %c0_17 = arith.constant 0 : index
    %24 = vector.load %arg7[%c0_16, %c0_17] : memref<128x128xbf16, #tpu.memory_space<vmem>>, vector<128x128xbf16>
    %cst_18 = arith.constant dense<0.000000e+00> : vector<16x128xf32>
    %25 = tpu.matmul %23, %24, %cst_18 {dimension_numbers = #tpu.dot_dimension_numbers<[1], [0], [0], [1], [0, 0, 1, 1], [], []>} : vector<16x128xbf16>, vector<128x128xbf16>, vector<16x128xf32> -> vector<16x128xf32>
    %c0_19 = arith.constant 0 : index
    %c0_20 = arith.constant 0 : index
    %26 = vector.load %arg8[%c0_19, %c0_20] : memref<1x128xf32, #tpu.memory_space<vmem>>, vector<1x128xf32>
    %27 = vector.broadcast %26 : vector<1x128xf32> to vector<16x128xf32>
    %28 = arith.addf %25, %27 : vector<16x128xf32>
    %cst_21 = arith.constant 0.000000e+00 : f32
    %29 = vector.broadcast %cst_21 : f32 to vector<16x128xf32>
    %30 = arith.maximumf %28, %29 : vector<16x128xf32>
    %31 = arith.truncf %30 : vector<16x128xf32> to vector<16x128xbf16>
    %c0_22 = arith.constant 0 : index
    %c0_23 = arith.constant 0 : index
    %32 = vector.load %arg9[%c0_22, %c0_23] : memref<128x128xbf16, #tpu.memory_space<vmem>>, vector<128x128xbf16>
    %cst_24 = arith.constant dense<0.000000e+00> : vector<16x128xf32>
    %33 = tpu.matmul %31, %32, %cst_24 {dimension_numbers = #tpu.dot_dimension_numbers<[1], [0], [0], [1], [0, 0, 1, 1], [], []>} : vector<16x128xbf16>, vector<128x128xbf16>, vector<16x128xf32> -> vector<16x128xf32>
    %c0_25 = arith.constant 0 : index
    %c0_26 = arith.constant 0 : index
    %34 = vector.load %arg10[%c0_25, %c0_26] : memref<1x128xf32, #tpu.memory_space<vmem>>, vector<1x128xf32>
    %35 = vector.broadcast %34 : vector<1x128xf32> to vector<16x128xf32>
    %36 = arith.addf %33, %35 : vector<16x128xf32>
    %37 = arith.negf %36 : vector<16x128xf32>
    %38 = math.exp %37 : vector<16x128xf32>
    %cst_27 = arith.constant 1.000000e+00 : f32
    %39 = vector.broadcast %cst_27 : f32 to vector<16x128xf32>
    %40 = arith.addf %39, %38 : vector<16x128xf32>
    %41 = arith.divf %39, %40 : vector<16x128xf32>
    %c0_28 = arith.constant 0 : index
    %c0_29 = arith.constant 0 : index
    %42 = vector.load %arg11[%c0_28, %c0_29] : memref<16x128xf32, #tpu.memory_space<vmem>>, vector<16x128xf32>
    tpu.vector_store %arg11[%c0_28, %c0_29], %41 {strides = array<i32>} : memref<16x128xf32, #tpu.memory_space<vmem>>, vector<16x128xf32>,
    return
  }
  func.func @transform_0(%arg0: i32) -> (i32, i32) {
    %c0_i32 = arith.constant 0 : i32
    %c0_i32_0 = arith.constant 0 : i32
    return %arg0, %c0_i32 : i32, i32
  }
  func.func @transform_1(%arg0: i32) -> (i32, i32) {
    %c0_i32 = arith.constant 0 : i32
    %c0_i32_0 = arith.constant 0 : i32
    return %arg0, %c0_i32 : i32, i32
  }
  func.func @transform_2(%arg0: i32) -> (i32, i32) {
    %c0_i32 = arith.constant 0 : i32
    %c0_i32_0 = arith.constant 0 : i32
    %c0_i32_1 = arith.constant 0 : i32
    return %c0_i32, %c0_i32_0 : i32, i32
  }
  func.func @transform_3(%arg0: i32) -> (i32, i32) {
    %c0_i32 = arith.constant 0 : i32
    %c0_i32_0 = arith.constant 0 : i32
    %c0_i32_1 = arith.constant 0 : i32
    return %c0_i32, %c0_i32_0 : i32, i32
  }
  func.func @transform_4(%arg0: i32) -> (i32, i32) {
    %c0_i32 = arith.constant 0 : i32
    %c0_i32_0 = arith.constant 0 : i32
    %c0_i32_1 = arith.constant 0 : i32
    return %c0_i32, %c0_i32_0 : i32, i32
  }
  func.func @transform_5(%arg0: i32) -> (i32, i32) {
    %c0_i32 = arith.constant 0 : i32
    %c0_i32_0 = arith.constant 0 : i32
    %c0_i32_1 = arith.constant 0 : i32
    return %c0_i32, %c0_i32_0 : i32, i32
  }
  func.func @transform_6(%arg0: i32) -> (i32, i32) {
    %c0_i32 = arith.constant 0 : i32
    %c0_i32_0 = arith.constant 0 : i32
    %c0_i32_1 = arith.constant 0 : i32
    return %c0_i32, %c0_i32_0 : i32, i32
  }
  func.func @transform_7(%arg0: i32) -> (i32, i32) {
    %c0_i32 = arith.constant 0 : i32
    %c0_i32_0 = arith.constant 0 : i32
    %c0_i32_1 = arith.constant 0 : i32
    return %c0_i32, %c0_i32_0 : i32, i32
  }
  func.func @transform_8(%arg0: i32) -> (i32, i32) {
    %c0_i32 = arith.constant 0 : i32
    %c0_i32_0 = arith.constant 0 : i32
    %c0_i32_1 = arith.constant 0 : i32
    return %c0_i32, %c0_i32_0 : i32, i32
  }
  func.func @transform_9(%arg0: i32) -> (i32, i32) {
    %c0_i32 = arith.constant 0 : i32
    %c0_i32_0 = arith.constant 0 : i32
    %c0_i32_1 = arith.constant 0 : i32
    return %c0_i32, %c0_i32_0 : i32, i32
  }
  func.func @transform_10(%arg0: i32) -> (i32, i32) {
    %c0_i32 = arith.constant 0 : i32
    %c0_i32_0 = arith.constant 0 : i32
    return %arg0, %c0_i32 : i32, i32
  }
  func.func @transform_11(%arg0: i32) -> (i32, i32) {
    %c0_i32 = arith.constant 0 : i32
    %c0_i32_0 = arith.constant 0 : i32
    return %arg0, %c0_i32 : i32, i32
  }
}

</mosaic_0001>

<bundles_post_ra>
// kernel: vae_forward.1
= control target key start
LH: loop header
LB: loop body
LE: loop exit
PB: predicated region body
PF: predicated region fallthrough
CT: control target
= control target key end

     0   :  { %17 = vsyncpa [#allocation3], 0  ;;  %s1061_s0 = inlined_call_operand.vmem [shape: bf16[16,128], index: 0, kind: input, shape index: {}]   ;;  %s1062_s1 = inlined_call_operand.vmem [shape: f32[16,128], index: 1, kind: input, shape index: {}]   ;;  %s1063_s2 = inlined_call_operand.vmem [shape: bf16[128,128], index: 2, kind: input, shape index: {}]   ;;  %s1064_s3 = inlined_call_operand.vmem [shape: f32[1,128], index: 3, kind: input, shape index: {}]   ;;  %s1065_s4 = inlined_call_operand.hbm [shape: bf16[128,256], index: 4, kind: input, shape index: {}]   ;;  %s1066_s5 = inlined_call_operand.vmem [shape: f32[1,256], index: 5, kind: input, shape index: {}]   ;;  %s1067_s6 = inlined_call_operand.hbm [shape: bf16[128,128], index: 6, kind: input, shape index: {}]   ;;  %s1068_s7 = inlined_call_operand.vmem [shape: f32[1,128], index: 7, kind: input, shape index: {}]   ;;  %s1069_s8 = inlined_call_operand.hbm [shape: bf16[128,128], index: 8, kind: input, shape index: {}]   ;;  %s1070_s9 = inlined_call_operand.vmem [shape: f32[1,128], index: 9, kind: input, shape index: {}]   ;;  %s1071_s10 = inlined_call_operand.vmem [shape: f32[16,128], index: 10, kind: output, shape index: {0}]   ;;  %s1072_s11 = inlined_call_operand.vmem [shape: f32[16,256], index: 11, kind: output, shape index: {1}]  }
   0x1   :  { %18 = vsyncpa [#allocation5], 0  ;;  %s889_s17 = smov [#allocation4]  }
   0x2   :  { %s46_s18 = sshll.u32 %s889_s17, 4  ;;  %s47_s18 = int_to_ptr.vmem [resolvable:$true] %s46_s18 }
   0x3   :  { %s833_s19 = scalar_lea.vmem %s47_s18, 1024  ;;  %p838_p1 = scmp.lt.s32.totalorder %s47_s18, %s47_s18 }
   0x4   :  { %p834_p0 = scmp.ne.s32.totalorder %s47_s18, %s833_s19  ;;  %p839_p2 = scmp.lt.s32.totalorder %s833_s19, %s833_s19 }
   0x6   :  { %p840_p3 = por %p839_p2, %p838_p1 }
   0x8   :  { %p841_p4 = pnand %p840_p3, %p834_p0 }
   0xa   :  { %844 = shalt.err (!%p841_p4)
}
   0xb   :  { %s890_s20 = smov 64   ;;  %s891_s21 = smov 4  }
   0xc   :  { %52 = dma.hbm_to_vmem [thread:$0]  %s1067_s6, 1024, %s47_s18, [#allocation5], %s890_s20, %s890_s20, %s891_s21  }
   0xd   :  { %s892_s24 = smov [#allocation2]  }
   0xe   :  { %s32_s25 = sshll.u32 %s892_s24, 4  ;;  %s33_s25 = int_to_ptr.vmem [resolvable:$true] %s32_s25 }
   0xf   :  { %s853_s26 = scalar_lea.vmem %s33_s25, 2048  ;;  %p858_p6 = scmp.lt.s32.totalorder %s33_s25, %s33_s25 }
  0x10   :  { %p854_p5 = scmp.ne.s32.totalorder %s33_s25, %s853_s26  ;;  %p859_p7 = scmp.lt.s32.totalorder %s853_s26, %s853_s26 }
  0x12   :  { %p860_p8 = por %p859_p7, %p858_p6 }
  0x14   :  { %p861_p9 = pnand %p860_p8, %p854_p5 }
  0x16   :  { %864 = shalt.err (!%p861_p9)
}
  0x17   :  { %s893_s27 = smov 128   ;;  %s894_s28 = smov 8  }
  0x18   :  { %38 = dma.hbm_to_vmem [thread:$0]  %s1065_s4, 2048, %s33_s25, [#allocation3], %s893_s27, %s893_s27, %s894_s28  }
  0x19   :  { %s895_s12 = smov [#allocation6]  }
  0x1a   :  { %s60_s13 = sshll.u32 %s895_s12, 4  ;;  %s61_s13 = int_to_ptr.vmem [resolvable:$true] %s60_s13 }
  0x1b   :  { %s873_s6 = scalar_lea.vmem %s61_s13, 1024  ;;  %p878_p11 = scmp.lt.s32.totalorder %s61_s13, %s61_s13 }
  0x1c   :  { %p874_p10 = scmp.ne.s32.totalorder %s61_s13, %s873_s6  ;;  %p879_p12 = scmp.lt.s32.totalorder %s873_s6, %s873_s6 }
  0x1e   :  { %p880_p13 = por %p879_p12, %p878_p11 }
  0x20   :  { %p881_p0 = pnand %p880_p13, %p874_p10 }
  0x22   :  { %884 = shalt.err (!%p881_p0)
}
  0x23   :  { %66 = dma.hbm_to_vmem [thread:$0]  %s1069_s8, 1024, %s61_s13, [#allocation5], %s890_s20, %s890_s20, %s891_s21  }
  0x24   :  { %885 = dma.done.wait [#allocation3], 2048  }
  0x25   :  { %886 = vsyncadd [#allocation3], 4294965248 }
  0x26   :  { %887 = dma.done.wait [#allocation5], 2048  }
  0x27   :  { %888 = vsyncadd [#allocation5], 4294965248  ;;  %v896_v0 = vmov 0.0   ;;  %vm897_vm0 = vmmov 0   ;;  %v764_v1 = vld [vmem:[%s1063_s2 + $0x38] sm:$0xff]   ;;  %v765_v2 = vld [vmem:[%s1063_s2 + $0x30] sm:$0xff]   ;;  %v220_v50 = vlaneseq }
  0x28   :  { %694 = vmatprep.subr.bf16.mxu0 %v896_v0  ;;  %710 = vmatprep.mubr.msk.bf16.mxu0 %vm897_vm0, %v896_v0  ;;  %v766_v3 = vld [vmem:[%s1063_s2 + $0x28] sm:$0xff]   ;;  %v767_v4 = vld [vmem:[%s1063_s2 + $0x20] sm:$0xff]   ;;  %v773_v5 = vld [vmem:[#allocation2 + $0x74] ss:$8 sps:$4 sm:$0xff]   ;;  %v898_v26 = vmov 0  }
  0x29   :  { %695 = vmatpush3.bf16.msra.mxu0 %v764_v1  ;;  %v775_v6 = vld [vmem:[#allocation2 + $0x70] ss:$8 sps:$4 sm:$0xff]   ;;  %310 = vmatprep.subr.bf16.mxu1 %v773_v5  ;;  %v776_v7 = vld [vmem:[#allocation2 + $0x64] ss:$8 sps:$4 sm:$0xff]   ;;  %v778_v8 = vld [vmem:[#allocation2 + $0x60] ss:$8 sps:$4 sm:$0xff]  }
  0x2a   :  { %696 = vmatprep.subr.bf16.mxu0 %v896_v0  ;;  %311 = vmatpush1.bf16.msra.mxu1 %v775_v6  ;;  %v779_v9 = vld [vmem:[#allocation2 + $0x54] ss:$8 sps:$4 sm:$0xff]   ;;  %v781_v12 = vld [vmem:[#allocation2 + $0x50] ss:$8 sps:$4 sm:$0xff]   ;;  %v782_v13 = vld [vmem:[#allocation2 + $0x44] ss:$8 sps:$4 sm:$0xff]  }
  0x2b   :  { %312 = vmatprep.subr.bf16.mxu1 %v776_v7  ;;  %v768_v10 = vld [vmem:[%s1063_s2 + $0x18] sm:$0xff]   ;;  %v769_v11 = vld [vmem:[%s1063_s2 + $0x10] sm:$0xff]   ;;  %v784_v14 = vld [vmem:[#allocation2 + $0x40] ss:$8 sps:$4 sm:$0xff]   ;;  %342 = vmatprep.mubr.bf16.mxu1 %v898_v26  ;;  %v221_v51 = vshrl.u32 %v220_v50, 7 }
  0x2c   :  { %v785_v15 = vld [vmem:[#allocation2 + $0x34] ss:$8 sps:$4 sm:$0xff]   ;;  %v770_v16 = vld [vmem:[%s1063_s2 + $0x8] sm:$0xff]   ;;  %v787_v17 = vld [vmem:[#allocation2 + $0x30] ss:$8 sps:$4 sm:$0xff]  }
  0x2d   :  { %697 = vmatpush3.bf16.msra.mxu0 %v765_v2  ;;  %v788_v18 = vld [vmem:[#allocation2 + $0x24] ss:$8 sps:$4 sm:$0xff]   ;;  %v790_v21 = vld [vmem:[#allocation2 + $0x20] ss:$8 sps:$4 sm:$0xff]   ;;  %v791_v22 = vld [vmem:[#allocation2 + $0x14] ss:$8 sps:$4 sm:$0xff]  }
  0x2e   :  { %698 = vmatprep.subr.bf16.mxu0 %v896_v0  ;;  %313 = vmatpush1.bf16.msra.mxu1 %v778_v8  ;;  %v771_v19 = vld [vmem:[%s1063_s2] sm:$0xff]   ;;  %v793_v23 = vld [vmem:[#allocation2 + $0x10] ss:$8 sps:$4 sm:$0xff]   ;;  %v799_v39 = vld [vmem:[#allocation4 + $0x28] sm:$0xff]   ;;  %v222_v52 = vsub.s32 0, %v221_v51  ;;  %v226_v54 = vsub.s32 1, %v221_v51 }
  0x2f   :  { %314 = vmatprep.subr.bf16.mxu1 %v779_v9  ;;  %v772_v20 = vld [vmem:[%s1061_s0] sm:$0xff]   ;;  %v797_v37 = vld [vmem:[#allocation4 + $0x38] sm:$0xff]   ;;  %v798_v38 = vld [vmem:[#allocation4 + $0x30] sm:$0xff]  }
  0x30   :  { %v794_v24 = vld [vmem:[#allocation2 + $0x4] ss:$8 sps:$4 sm:$0xff]   ;;  %v796_v25 = vld [vmem:[#allocation2] ss:$8 sps:$4 sm:$0xff]   ;;  %v801_v41 = vld [vmem:[#allocation4 + $0x18] sm:$0xff]  }
  0x31   :  { %699 = vmatpush3.bf16.msra.mxu0 %v766_v3  ;;  %v621_v27 = vld [vmem:[%s1064_s3] ss:$0 sm:$0xff]  ;;  %v802_v42 = vld [vmem:[#allocation4 + $0x10] sm:$0xff]   ;;  %v803_v43 = vld [vmem:[#allocation4 + $0x8] sm:$0xff]  }
  0x32   :  { %700 = vmatprep.subr.bf16.mxu0 %v896_v0  ;;  %315 = vmatpush1.bf16.msra.mxu1 %v781_v12  ;;  %v800_v40 = vld [vmem:[#allocation4 + $0x20] sm:$0xff]   ;;  %v805_v45 = vld [vmem:[#allocation6 + $0x38] sm:$0xff]   ;;  %v806_v46 = vld [vmem:[#allocation6 + $0x30] sm:$0xff]  }
  0x33   :  { %316 = vmatprep.subr.bf16.mxu1 %v782_v13  ;;  %v804_v44 = vld [vmem:[#allocation4] sm:$0xff]   ;;  %v807_v47 = vld [vmem:[#allocation6 + $0x28] sm:$0xff]   ;;  %v809_v49 = vld [vmem:[#allocation6 + $0x18] sm:$0xff]  }
  0x34   :  { %v808_v48 = vld [vmem:[#allocation6 + $0x20] sm:$0xff]   ;;  %v358_v8 = vld [vmem:[%s1062_s1 + $0x8] sm:$0xff] }
  0x35   :  { %701 = vmatpush3.bf16.msra.mxu0 %v767_v4  ;;  %v218_v53 = vld [vmem:[%s1066_s5] sm:$0x3] }
  0x36   :  { %702 = vmatprep.subr.bf16.mxu0 %v896_v0  ;;  %317 = vmatpush1.bf16.msra.mxu1 %v784_v14  ;;  %v223_v55 = vrot.slane %v218_v53, %v222_v52  ;;  %v227_v56 = vrot.slane %v218_v53, %v226_v54  ;;  %v357_v7 = vld [vmem:[%s1062_s1] sm:$0xff] }
  0x37   :  { %318 = vmatprep.subr.bf16.mxu1 %v785_v15  ;;  %v810_v15 = vld [vmem:[#allocation6 + $0x10] sm:$0xff]  }
  0x39   :  { %703 = vmatpush3.bf16.msra.mxu0 %v768_v10 }
  0x3a   :  { %704 = vmatprep.subr.bf16.mxu0 %v896_v0  ;;  %319 = vmatpush1.bf16.msra.mxu1 %v787_v17  ;;  %v812_v17 = vld [vmem:[#allocation6] sm:$0xff]  }
  0x3b   :  { %320 = vmatprep.subr.bf16.mxu1 %v788_v18  ;;  %v647_v18 = vld [vmem:[%s1068_s7] ss:$0 sm:$0xff] }
  0x3d   :  { %705 = vmatpush3.bf16.msra.mxu0 %v769_v11 }
  0x3e   :  { %706 = vmatprep.subr.bf16.mxu0 %v896_v0  ;;  %321 = vmatpush1.bf16.msra.mxu1 %v790_v21 }
  0x3f   :  { %322 = vmatprep.subr.bf16.mxu1 %v791_v22 }
  0x41   :  { %707 = vmatpush3.bf16.msra.mxu0 %v770_v16  ;;  %v811_v16 = vld [vmem:[#allocation6 + $0x8] sm:$0xff]  }
  0x42   :  { %708 = vmatprep.subr.bf16.mxu0 %v896_v0  ;;  %323 = vmatpush1.bf16.msra.mxu1 %v793_v23 }
  0x43   :  { %324 = vmatprep.subr.bf16.mxu1 %v794_v24 }
  0x45   :  { %709 = vmatpush3.bf16.msra.mxu0 %v771_v19 }
  0x46   :  { %714 = vmatprep.subr.bf16.mxu0 %v896_v0  ;;  %325 = vmatpush1.bf16.msra.mxu1 %v796_v25 }
  0x47   :  { %734 = vmatprep.subr.bf16.mxu1 %v896_v0 }
  0x48   :  { %711 = vmatmul.mubr.bf16.vlgmr.msra.gmra.mxu0 %v772_v20 }
  0x49   :  { %730 = vmatprep.mubr.msk.bf16.mxu0 %vm897_vm0, %v896_v0  ;;  %715 = vmatpush3.bf16.msra.mxu0 %v797_v37 }
  0x4a   :  { %716 = vmatprep.subr.bf16.mxu0 %v896_v0 }
  0x4d   :  { %717 = vmatpush3.bf16.msra.mxu0 %v798_v38 }
  0x4e   :  { %718 = vmatprep.subr.bf16.mxu0 %v896_v0 }
  0x51   :  { %719 = vmatpush3.bf16.msra.mxu0 %v799_v39 }
  0x52   :  { %720 = vmatprep.subr.bf16.mxu0 %v896_v0 }
  0x55   :  { %721 = vmatpush3.bf16.msra.mxu0 %v800_v40 }
  0x56   :  { %722 = vmatprep.subr.bf16.mxu0 %v896_v0 }
  0x59   :  { %723 = vmatpush3.bf16.msra.mxu0 %v801_v41 }
  0x5a   :  { %724 = vmatprep.subr.bf16.mxu0 %v896_v0 }
  0x5d   :  { %725 = vmatpush3.bf16.msra.mxu0 %v802_v42 }
  0x5e   :  { %726 = vmatprep.subr.bf16.mxu0 %v896_v0 }
  0x61   :  { %727 = vmatpush3.bf16.msra.mxu0 %v803_v43 }
  0x62   :  { %728 = vmatprep.subr.bf16.mxu0 %v896_v0 }
  0x65   :  { %729 = vmatpush3.bf16.msra.mxu0 %v804_v44 }
 0x108   :  { %v192_v28 = vpop.f32.mrf.mxu0 }
 0x109   :  { %v193_v30 = vadd.f32 %v621_v27, %v192_v28 }
 0x10a   :  { %v712_v29 = vpop.f32.mrf.mxu0 }
 0x10b   :  { %v199_v34 = vmax.f32 %v193_v30, 0.0 }
 0x10c   :  { %v195_v31 = vpop.f32.mrf.mxu0 }
 0x10d   :  { %v196_v32 = vadd.f32 %v621_v27, %v195_v31 }
 0x10e   :  { %v713_v33 = vpop.f32.mrf.mxu0 }
 0x10f   :  { %v200_v35 = vmax.f32 %v196_v32, 0.0 }
 0x111   :  { %v201_v36 = vpack.c.bf16 %v200_v35, %v199_v34 }
 0x113   :  { %343 = vmatmul.mubr.bf16.vlgmr.msra.gmra.mxu1 %v201_v36 }
 0x114   :  { %750 = vmatprep.mubr.msk.bf16.mxu1 %vm897_vm0, %v896_v0  ;;  %735 = vmatpush3.bf16.msra.mxu1 %v805_v45 }
 0x115   :  { %736 = vmatprep.subr.bf16.mxu1 %v896_v0 }
 0x118   :  { %737 = vmatpush3.bf16.msra.mxu1 %v806_v46 }
 0x119   :  { %738 = vmatprep.subr.bf16.mxu1 %v896_v0 }
 0x11c   :  { %739 = vmatpush3.bf16.msra.mxu1 %v807_v47 }
 0x11d   :  { %740 = vmatprep.subr.bf16.mxu1 %v896_v0 }
 0x120   :  { %741 = vmatpush3.bf16.msra.mxu1 %v808_v48 }
 0x121   :  { %742 = vmatprep.subr.bf16.mxu1 %v896_v0 }
 0x124   :  { %743 = vmatpush3.bf16.msra.mxu1 %v809_v49 }
 0x125   :  { %744 = vmatprep.subr.bf16.mxu1 %v896_v0 }
 0x128   :  { %745 = vmatpush3.bf16.msra.mxu1 %v810_v15 }
 0x129   :  { %746 = vmatprep.subr.bf16.mxu1 %v896_v0 }
 0x12c   :  { %747 = vmatpush3.bf16.msra.mxu1 %v811_v16 }
 0x12d   :  { %748 = vmatprep.subr.bf16.mxu1 %v896_v0  ;;  %v656_v0 = vld [vmem:[%s1070_s9] ss:$0 sm:$0xff] }
 0x130   :  { %749 = vmatpush3.bf16.msra.mxu1 %v812_v17 }
 0x1d3   :  { %v344_v57 = vpop.f32.mrf.mxu1 }
 0x1d4   :  { %v345_v58 = vadd.f32 %v344_v57, %v223_v55 }
 0x1d5   :  { %v346_v59 = vpop.f32.mrf.mxu1 }
 0x1d6   :  { %353 = vst [vmem:[%s1072_s11] sm:$0xff] %v345_v58  ;;  %v347_v60 = vadd.f32 %v346_v59, %v227_v56 }
 0x1d7   :  { %v348_v61 = vpop.f32.mrf.mxu1 }
 0x1d8   :  { %354 = vst [vmem:[%s1072_s11 + $0x8] sm:$0xff] %v347_v60  ;;  %v359_v62 = vmul.f32 0.5, %v347_v60  ;;  %v349_v63 = vadd.f32 %v348_v61, %v223_v55 }
 0x1d9   :  { %v350_v1 = vpop.f32.mrf.mxu1 }
 0x1da   :  { %v361_v2 = vmul.f32 1.442695, %v359_v62  ;;  %355 = vst [vmem:[%s1072_s11 + $0x10] sm:$0xff] %v349_v63  ;;  %v351_v3 = vadd.f32 %v350_v1, %v227_v56 }
 0x1dc   :  { %813 = vpow2.f32 %v361_v2  ;;  %356 = vst [vmem:[%s1072_s11 + $0x18] sm:$0xff] %v351_v3  ;;  %v360_v4 = vmul.f32 0.5, %v351_v3 }
 0x1de   :  { %v363_v5 = vmul.f32 1.442695, %v360_v4 }
 0x1e0   :  { %815 = vpow2.f32 %v363_v5 }
 0x1e9   :  { %v814_v6 = vpop.eup %813 }
 0x1ea   :  { %v365_v9 = vmul.f32 %v814_v6, %v357_v7 }
 0x1ec   :  { %v367_v12 = vadd.f32 %v365_v9, %v345_v58 }
 0x1ed   :  { %v816_v10 = vpop.eup %815 }
 0x1ee   :  { %v366_v11 = vmul.f32 %v816_v10, %v358_v8 }
 0x1f0   :  { %v368_v13 = vadd.f32 %v366_v11, %v349_v63 }
 0x1f2   :  { %v369_v14 = vpack.c.bf16 %v368_v13, %v367_v12 }
 0x1f4   :  { %731 = vmatmul.mubr.bf16.vlgmr.msra.gmra.mxu0 %v369_v14 }
 0x2b4   :  { %v475_v19 = vpop.f32.mrf.mxu0 }
 0x2b5   :  { %v476_v21 = vadd.f32 %v647_v18, %v475_v19 }
 0x2b6   :  { %v732_v20 = vpop.f32.mrf.mxu0 }
 0x2b7   :  { %v482_v25 = vmax.f32 %v476_v21, 0.0 }
 0x2b8   :  { %v478_v22 = vpop.f32.mrf.mxu0 }
 0x2b9   :  { %v479_v23 = vadd.f32 %v647_v18, %v478_v22 }
 0x2ba   :  { %v733_v24 = vpop.f32.mrf.mxu0 }
 0x2bb   :  { %v483_v26 = vmax.f32 %v479_v23, 0.0 }
 0x2bd   :  { %v484_v27 = vpack.c.bf16 %v483_v26, %v482_v25 }
 0x2bf   :  { %751 = vmatmul.mubr.bf16.vlgmr.msra.gmra.mxu1 %v484_v27 }
 0x37f   :  { %v590_v28 = vpop.f32.mrf.mxu1 }
 0x380   :  { %v591_v29 = vadd.f32 %v656_v0, %v590_v28 }
 0x381   :  { %v752_v30 = vpop.f32.mrf.mxu1 }
 0x382   :  { %v665_v31 = vmul.f32 -1.442695, %v591_v29 }
 0x383   :  { %v593_v32 = vpop.f32.mrf.mxu1 }
 0x384   :  { %817 = vpow2.f32 %v665_v31  ;;  %v594_v33 = vadd.f32 %v656_v0, %v593_v32 }
 0x385   :  { %v753_v34 = vpop.f32.mrf.mxu1 }
 0x386   :  { %v666_v35 = vmul.f32 -1.442695, %v594_v33 }
 0x388   :  { %819 = vpow2.f32 %v666_v35 }
 0x391   :  { %v818_v36 = vpop.eup %817 }
 0x392   :  { %v603_v37 = vadd.f32 1.0, %v818_v36 }
 0x394   :  { %821 = vrcp.f32 %v603_v37 }
 0x395   :  { %v820_v38 = vpop.eup %819 }
 0x396   :  { %v604_v39 = vadd.f32 1.0, %v820_v38 }
 0x398   :  { %823 = vrcp.f32 %v604_v39 }
 0x3a1   :  { %v822_v40 = vpop.eup %821 }
 0x3a2   :  { %609 = vst [vmem:[%s1071_s10] sm:$0xff] %v822_v40 }
 0x3a5   :  { %v824_v41 = vpop.eup %823 }
 0x3a6   :  { %610 = vst [vmem:[%s1071_s10 + $0x8] sm:$0xff] %v824_v41 }
 0x3a7   :  { %619 = vsyncpa [#allocation3], 1 }
 0x3a8   :  { %620 = vsyncpa [#allocation5], 1 }

</bundles_post_ra>
